<compile_context>
chip_gen: v6e
topology: v6e:2x2x1
jax: 0.10.0
libtpu: 0.0.40
codegen_flags: <defaults>
</compile_context>

<pallas_src>
import functools

import jax
import jax.numpy as jnp
from jax.experimental import pallas as pl
from jax.experimental.pallas import tpu as pltpu

STATE_DIM = 10
ACTION_DIM = 4
H1 = 64
H2 = 32


def _round_up(x, m):
    return ((x + m - 1) // m) * m


def _choose_tm(n, tm_max=512):
    """Batch tile: big enough to amortize per-step overhead (~0.35us), but
    leave >= 2 grid steps when there is enough work so both v7x TCs are used."""
    n128 = _round_up(max(n, 1), 128)
    if n128 <= 128:
        return 128
    if n128 <= tm_max:
        return _round_up((n128 + 1) // 2, 128)
    return tm_max


def _qfunc_kernel(xt_ref, w1t_ref, b1t_ref, w2t_ref, b2t_ref, w3t_ref, b3t_ref,
                  o_ref):
    # xt_ref: (D, tm) tile of the transposed [state, action] input.
    xt = xt_ref[...]
    h1 = jnp.dot(w1t_ref[...], xt, preferred_element_type=jnp.float32) + b1t_ref[...]
    h1 = jnp.maximum(h1, 0.0)                               # (H1, tm)
    h2 = jnp.dot(w2t_ref[...], h1, preferred_element_type=jnp.float32) + b2t_ref[...]
    h2 = jnp.maximum(h2, 0.0)                               # (H2, tm)
    q = jnp.dot(w3t_ref[...], h2, preferred_element_type=jnp.float32) + b3t_ref[...]
    o_ref[...] = q                                          # (1, tm) lane-dense


@functools.partial(jax.jit, static_argnames=("tm",))
def _qfunc_pallas(x_t, w1t, b1t, w2t, b2t, w3t, b3t, *, tm):
    d, n_pad = x_t.shape
    grid = (n_pad // tm,)
    return pl.pallas_call(
        _qfunc_kernel,
        out_shape=jax.ShapeDtypeStruct((1, n_pad), jnp.float32),
        grid_spec=pltpu.PrefetchScalarGridSpec(
            num_scalar_prefetch=0,
            grid=grid,
            in_specs=[
                pl.BlockSpec((d, tm), lambda i: (0, i)),      # x^T tile
                pl.BlockSpec((H1, d), lambda i: (0, 0)),      # W1^T (full, resident)
                pl.BlockSpec((H1, 1), lambda i: (0, 0)),      # b1 column
                pl.BlockSpec((H2, H1), lambda i: (0, 0)),     # W2^T
                pl.BlockSpec((H2, 1), lambda i: (0, 0)),      # b2 column
                pl.BlockSpec((1, H2), lambda i: (0, 0)),      # W3^T row
                pl.BlockSpec((1, 1), lambda i: (0, 0)),       # b3
            ],
            out_specs=pl.BlockSpec((1, tm), lambda i: (0, i)),
        ),
        compiler_params=pltpu.CompilerParams(
            dimension_semantics=("parallel",),
        ),
    )(x_t, w1t, b1t, w2t, b2t, w3t, b3t)


def q_function_forward(state, action, params, *, tm_max=512):
    """Replicates QFunction.forward semantics (including multiple_actions path)."""
    w1, b1, w2, b2, w3, b3 = params
    multiple_actions = False
    batch_size = state.shape[0]
    if action.ndim == 3 and state.ndim == 2:
        multiple_actions = True
        repeat = action.shape[1]
        # extend_and_repeat without materializing the repeat: broadcast fuses
        # into the concat/transpose below.
        state = jnp.broadcast_to(
            state[:, None, :], (batch_size, repeat, state.shape[-1])
        ).reshape(-1, state.shape[-1])
        action = action.reshape(-1, action.shape[-1])

    # Transposed input (D, N): batch lands on the lane axis inside the kernel.
    x_t = jnp.concatenate(
        [state.astype(jnp.float32), action.astype(jnp.float32)], axis=-1
    ).T                                                     # (D, N)
    d, n = x_t.shape
    tm = _choose_tm(n, tm_max)
    n_pad = _round_up(n, tm)
    x_t = jnp.pad(x_t, ((0, 0), (0, n_pad - n)))

    q_pad = _qfunc_pallas(
        x_t,
        w1.T, b1.reshape(-1, 1),
        w2.T, b2.reshape(-1, 1),
        w3.T, b3.reshape(-1, 1),
        tm=tm,
    )                                                       # (1, n_pad)
    q_values = q_pad[0, :n]                                 # squeeze(dim=-1)
    if multiple_actions:
        q_values = q_values.reshape(batch_size, -1)
    return q_values


def init_params(key, state_dim, action_dim):
    """Deterministic init matching nn.Linear default (uniform +-1/sqrt(fan_in))."""
    def linear(k, fan_in, fan_out):
        kw, kb = jax.random.split(k)
        bound = 1.0 / jnp.sqrt(fan_in)
        w = jax.random.uniform(kw, (fan_in, fan_out), jnp.float32, -bound, bound)
        b = jax.random.uniform(kb, (1, fan_out), jnp.float32, -bound, bound)
        return w, b

    k1, k2, k3 = jax.random.split(key, 3)
    w1, b1 = linear(k1, state_dim + action_dim, H1)
    w2, b2 = linear(k2, H1, H2)
    w3, b3 = linear(k3, H2, 1)
    return (w1, b1, w2, b2, w3, b3)


def _ref_forward(state, action, params):
    """Pure-JAX reference for correctness check."""
    w1, b1, w2, b2, w3, b3 = params
    multiple_actions = False
    batch_size = state.shape[0]
    if action.ndim == 3 and state.ndim == 2:
        multiple_actions = True
        repeat = action.shape[1]
        state = jnp.repeat(state[:, None, :], repeat, axis=1).reshape(-1, state.shape[-1])
        action = action.reshape(-1, action.shape[-1])
    x = jnp.concatenate([state, action], axis=-1)
    h1 = jax.nn.relu(x @ w1 + b1)
    h2 = jax.nn.relu(h1 @ w2 + b2)
    q = (h2 @ w3 + b3)[:, 0]
    if multiple_actions:
        q = q.reshape(batch_size, -1)
    return q


if __name__ == "__main__":
    key = jax.random.PRNGKey(0)
    kp, ks, ka, ka3, ks2, ka2 = jax.random.split(key, 6)

    params = init_params(kp, STATE_DIM, ACTION_DIM)

    batch = 2
    state = jax.random.normal(ks, (batch, STATE_DIM), jnp.float32)

    # Case 1: single action per state -> q shape (batch,)
    action = jax.random.normal(ka, (batch, ACTION_DIM), jnp.float32)
    q1 = q_function_forward(state, action, params)
    jax.block_until_ready(q1)

    # Case 2: multiple actions per state -> q shape (batch, repeat)
    repeat = 3
    action3 = jax.random.normal(ka3, (batch, repeat, ACTION_DIM), jnp.float32)
    q2 = q_function_forward(state, action3, params)
    jax.block_until_ready(q2)

    # Case 3: larger batch with multiple actions -> exercises tm=512, grid>1.
    big_batch, big_repeat = 300, 4
    state_big = jax.random.normal(ks2, (big_batch, STATE_DIM), jnp.float32)
    action_big = jax.random.normal(ka2, (big_batch, big_repeat, ACTION_DIM), jnp.float32)
    q3 = q_function_forward(state_big, action_big, params)
    jax.block_until_ready(q3)

    # Verify against pure-JAX reference.
    r1 = _ref_forward(state, action, params)
    r2 = _ref_forward(state, action3, params)
    r3 = _ref_forward(state_big, action_big, params)
    assert q1.shape == (batch,)
    assert q2.shape == (batch, repeat)
    assert q3.shape == (big_batch, big_repeat)
    assert jnp.allclose(q1, r1, atol=1e-5, rtol=1e-5)
    assert jnp.allclose(q2, r2, atol=1e-5, rtol=1e-5)
    assert jnp.allclose(q3, r3, atol=1e-5, rtol=1e-5)

    print("KERNEL_OK")
</pallas_src>

<mosaic_0001>
module attributes {stable_mosaic.version = 11 : i64} {
  func.func @_qfunc_kernel(%arg0: i32, %arg1: memref<14x128xf32, #tpu.memory_space<vmem>>, %arg2: memref<64x14xf32, #tpu.memory_space<vmem>>, %arg3: memref<64x1xf32, #tpu.memory_space<vmem>>, %arg4: memref<32x64xf32, #tpu.memory_space<vmem>>, %arg5: memref<32x1xf32, #tpu.memory_space<vmem>>, %arg6: memref<1x32xf32, #tpu.memory_space<vmem>>, %arg7: memref<1x1xf32, #tpu.memory_space<vmem>>, %arg8: memref<1x128xf32, #tpu.memory_space<vmem>>) attributes {dimension_semantics = [#tpu.dimension_semantics<parallel>], iteration_bounds = array<i64: 1>, scalar_prefetch = 0 : i64, scratch_operands = 0 : i64, tpu.core_type = #tpu.core_type<tc>, window_params = [{transform_indices = @transform_0, window_bounds = array<i64: 14, 128>}, {pipeline_mode = #tpu.pipeline_mode<synchronous>, transform_indices = @transform_1, window_bounds = array<i64: 64, 14>}, {pipeline_mode = #tpu.pipeline_mode<synchronous>, transform_indices = @transform_2, window_bounds = array<i64: 64, 1>}, {pipeline_mode = #tpu.pipeline_mode<synchronous>, transform_indices = @transform_3, window_bounds = array<i64: 32, 64>}, {pipeline_mode = #tpu.pipeline_mode<synchronous>, transform_indices = @transform_4, window_bounds = array<i64: 32, 1>}, {pipeline_mode = #tpu.pipeline_mode<synchronous>, transform_indices = @transform_5, window_bounds = array<i64: 1, 32>}, {pipeline_mode = #tpu.pipeline_mode<synchronous>, transform_indices = @transform_6, window_bounds = array<i64: 1, 1>}, {transform_indices = @transform_7, window_bounds = array<i64: 1, 128>}]} {
    %c0 = arith.constant 0 : index
    %c0_0 = arith.constant 0 : index
    %0 = vector.load %arg1[%c0, %c0_0] : memref<14x128xf32, #tpu.memory_space<vmem>>, vector<14x128xf32>
    %c0_1 = arith.constant 0 : index
    %c0_2 = arith.constant 0 : index
    %1 = vector.load %arg2[%c0_1, %c0_2] : memref<64x14xf32, #tpu.memory_space<vmem>>, vector<64x14xf32>
    %cst = arith.constant dense<0.000000e+00> : vector<64x128xf32>
    %2 = tpu.matmul %1, %0, %cst {dimension_numbers = #tpu.dot_dimension_numbers<[1], [0], [0], [1], [0, 0, 1, 1], [], []>} : vector<64x14xf32>, vector<14x128xf32>, vector<64x128xf32> -> vector<64x128xf32>
    %c0_3 = arith.constant 0 : index
    %c0_4 = arith.constant 0 : index
    %3 = vector.load %arg3[%c0_3, %c0_4] : memref<64x1xf32, #tpu.memory_space<vmem>>, vector<64x1xf32>
    %4 = vector.broadcast %3 : vector<64x1xf32> to vector<64x128xf32>
    %5 = arith.addf %2, %4 : vector<64x128xf32>
    %cst_5 = arith.constant 0.000000e+00 : f32
    %6 = vector.broadcast %cst_5 : f32 to vector<64x128xf32>
    %7 = arith.maximumf %5, %6 : vector<64x128xf32>
    %c0_6 = arith.constant 0 : index
    %c0_7 = arith.constant 0 : index
    %8 = vector.load %arg4[%c0_6, %c0_7] : memref<32x64xf32, #tpu.memory_space<vmem>>, vector<32x64xf32>
    %cst_8 = arith.constant dense<0.000000e+00> : vector<32x128xf32>
    %9 = tpu.matmul %8, %7, %cst_8 {dimension_numbers = #tpu.dot_dimension_numbers<[1], [0], [0], [1], [0, 0, 1, 1], [], []>} : vector<32x64xf32>, vector<64x128xf32>, vector<32x128xf32> -> vector<32x128xf32>
    %c0_9 = arith.constant 0 : index
    %c0_10 = arith.constant 0 : index
    %10 = vector.load %arg5[%c0_9, %c0_10] : memref<32x1xf32, #tpu.memory_space<vmem>>, vector<32x1xf32>
    %11 = vector.broadcast %10 : vector<32x1xf32> to vector<32x128xf32>
    %12 = arith.addf %9, %11 : vector<32x128xf32>
    %cst_11 = arith.constant 0.000000e+00 : f32
    %13 = vector.broadcast %cst_11 : f32 to vector<32x128xf32>
    %14 = arith.maximumf %12, %13 : vector<32x128xf32>
    %c0_12 = arith.constant 0 : index
    %c0_13 = arith.constant 0 : index
    %15 = vector.load %arg6[%c0_12, %c0_13] : memref<1x32xf32, #tpu.memory_space<vmem>>, vector<1x32xf32>
    %cst_14 = arith.constant dense<0.000000e+00> : vector<1x128xf32>
    %16 = tpu.matmul %15, %14, %cst_14 {dimension_numbers = #tpu.dot_dimension_numbers<[1], [0], [0], [1], [0, 0, 1, 1], [], []>} : vector<1x32xf32>, vector<32x128xf32>, vector<1x128xf32> -> vector<1x128xf32>
    %c0_15 = arith.constant 0 : index
    %c0_16 = arith.constant 0 : index
    %17 = vector.load %arg7[%c0_15, %c0_16] : memref<1x1xf32, #tpu.memory_space<vmem>>, vector<1x1xf32>
    %18 = vector.broadcast %17 : vector<1x1xf32> to vector<1x128xf32>
    %19 = arith.addf %16, %18 : vector<1x128xf32>
    %c0_17 = arith.constant 0 : index
    %c0_18 = arith.constant 0 : index
    %20 = vector.load %arg8[%c0_17, %c0_18] : memref<1x128xf32, #tpu.memory_space<vmem>>, vector<1x128xf32>
    tpu.vector_store %arg8[%c0_17, %c0_18], %19 {strides = array<i32>} : memref<1x128xf32, #tpu.memory_space<vmem>>, vector<1x128xf32>,
    return
  }
  func.func @transform_0(%arg0: i32) -> (i32, i32) {
    %c0_i32 = arith.constant 0 : i32
    %c0_i32_0 = arith.constant 0 : i32
    return %c0_i32, %arg0 : i32, i32
  }
  func.func @transform_1(%arg0: i32) -> (i32, i32) {
    %c0_i32 = arith.constant 0 : i32
    %c0_i32_0 = arith.constant 0 : i32
    %c0_i32_1 = arith.constant 0 : i32
    return %c0_i32, %c0_i32_0 : i32, i32
  }
  func.func @transform_2(%arg0: i32) -> (i32, i32) {
    %c0_i32 = arith.constant 0 : i32
    %c0_i32_0 = arith.constant 0 : i32
    %c0_i32_1 = arith.constant 0 : i32
    return %c0_i32, %c0_i32_0 : i32, i32
  }
  func.func @transform_3(%arg0: i32) -> (i32, i32) {
    %c0_i32 = arith.constant 0 : i32
    %c0_i32_0 = arith.constant 0 : i32
    %c0_i32_1 = arith.constant 0 : i32
    return %c0_i32, %c0_i32_0 : i32, i32
  }
  func.func @transform_4(%arg0: i32) -> (i32, i32) {
    %c0_i32 = arith.constant 0 : i32
    %c0_i32_0 = arith.constant 0 : i32
    %c0_i32_1 = arith.constant 0 : i32
    return %c0_i32, %c0_i32_0 : i32, i32
  }
  func.func @transform_5(%arg0: i32) -> (i32, i32) {
    %c0_i32 = arith.constant 0 : i32
    %c0_i32_0 = arith.constant 0 : i32
    %c0_i32_1 = arith.constant 0 : i32
    return %c0_i32, %c0_i32_0 : i32, i32
  }
  func.func @transform_6(%arg0: i32) -> (i32, i32) {
    %c0_i32 = arith.constant 0 : i32
    %c0_i32_0 = arith.constant 0 : i32
    %c0_i32_1 = arith.constant 0 : i32
    return %c0_i32, %c0_i32_0 : i32, i32
  }
  func.func @transform_7(%arg0: i32) -> (i32, i32) {
    %c0_i32 = arith.constant 0 : i32
    %c0_i32_0 = arith.constant 0 : i32
    return %c0_i32, %arg0 : i32, i32
  }
}

</mosaic_0001>

<bundles_post_ra>
// kernel: _qfunc_pallas.1
= control target key start
LH: loop header
LB: loop body
LE: loop exit
PB: predicated region body
PF: predicated region fallthrough
CT: control target
= control target key end

     0   :  { %s720_s0 = inlined_call_operand.vmem [shape: f32[14,128], index: 0, kind: input, shape index: {}]   ;;  %s721_s1 = inlined_call_operand.vmem [shape: f32[64,14], index: 1, kind: input, shape index: {}]   ;;  %s722_s2 = inlined_call_operand.vmem [shape: f32[64,1], index: 2, kind: input, shape index: {}]   ;;  %s723_s3 = inlined_call_operand.vmem [shape: f32[32,64], index: 3, kind: input, shape index: {}]   ;;  %s724_s4 = inlined_call_operand.vmem [shape: f32[32,1], index: 4, kind: input, shape index: {}]   ;;  %s725_s5 = inlined_call_operand.vmem [shape: f32[1,32], index: 5, kind: input, shape index: {}]   ;;  %s726_s6 = inlined_call_operand.<no memory space> [shape: f32[1,1], index: 6, kind: input, shape index: {}]   ;;  %s727_s7 = inlined_call_operand.hbm [shape: f32[1,128], index: 7, kind: output, shape index: {}]  }
   0x1   :  { %v12_v0 = vstv %s726_s6 }
   0x2   :  { %13 = vst [vmem:[#allocation2] sm:$0x1] %v12_v0 }
   0x3   :  { %v30_v1 = vld [vmem:[%s720_s0 + $0x8] sm:$0x3f]  ;;  %vm112_vm0 = vcmask 1045504   ;;  %v29_v2 = vld [vmem:[%s720_s0] sm:$0xff]  ;;  %vm87_vm1 = vcmask 113664   ;;  %v577_v5 = vmov 0  }
   0x4   :  { %v31_v3 = vld [vmem:[%s721_s1] sm:$0xff]  ;;  %500 = vmatprep.subr.msk.mxu0 %vm112_vm0, %v30_v1  ;;  %v32_v4 = vld [vmem:[%s721_s1 + $0x8] sm:$0xff]  ;;  %553 = vset.pattern.permute.xlu0 %v577_v5  ;;  %v33_v6 = vld [vmem:[%s721_s1 + $0x10] sm:$0xff] }
   0x5   :  { %504 = vmatprep.mubr.msk.f32.mxu0 %vm87_vm1, %v31_v3  ;;  %501 = vmatpush3.msk.msra.mxu0 %vm112_vm0, %v30_v1  ;;  %v46_v7 = vld [vmem:[%s722_s2 + $0x38] sm:$0xff]  ;;  %v44_v8 = vld [vmem:[%s722_s2 + $0x28] sm:$0xff]  ;;  %v45_v9 = vld [vmem:[%s722_s2 + $0x30] sm:$0xff] }
   0x6   :  { %502 = vmatprep.subr.mxu0 %v29_v2  ;;  %554 = vset.pattern.permute.xlu1 %v577_v5  ;;  %v34_v10 = vld [vmem:[%s721_s1 + $0x18] sm:$0xff]  ;;  %v43_v11 = vld [vmem:[%s722_s2 + $0x20] sm:$0xff] }
   0x7   :  { %503 = vmatpush3.msra.mxu0 %v29_v2  ;;  %84 = vperm.xlu0 %553, %v46_v7   ;;  %v35_v12 = vld [vmem:[%s721_s1 + $0x20] sm:$0xff] }
   0x8   :  { %505 = vmatmul.mubr.msk.f32.vlgmr.msra.gmra.mxu0 %vm87_vm1, %v32_v4  ;;  %74 = vperm.xlu1 %554, %v44_v8  }
   0x9   :  { %507 = vmatprep.mubr.msk.f32.mxu0 %vm87_vm1, %v33_v6 }
   0xa   :  { %14 = vsyncpa [#allocation4], 0  ;;  %v42_v13 = vld [vmem:[%s722_s2 + $0x18] sm:$0xff]  ;;  %v36_v14 = vld [vmem:[%s721_s1 + $0x28] sm:$0xff]  ;;  %vm257_vm2 = vcmask 523264   ;;  %v578_v61 = vmov 0.0  }
   0xb   :  { %79 = vperm.xlu0 %553, %v45_v9   ;;  %v41_v15 = vld [vmem:[%s722_s2 + $0x10] sm:$0xff]  ;;  %v40_v17 = vld [vmem:[%s722_s2 + $0x8] sm:$0xff]  ;;  %v38_v18 = vld [vmem:[%s721_s1 + $0x38] sm:$0xff]  ;;  %538 = vmatprep.subr.mxu0 %v578_v61  ;;  %vm579_vm3 = vmmov 0   ;;  %vm370_vm4 = vcmask 261120   ;;  %s580_s26 = smov [#allocation3]  }
   0xc   :  { %508 = vmatmul.mubr.msk.f32.gmra.mxu0 %vm87_vm1, %v34_v10  ;;  %69 = vperm.xlu1 %554, %v43_v11   ;;  %v37_v16 = vld [vmem:[%s721_s1 + $0x30] sm:$0xff]  ;;  %v39_v19 = vld [vmem:[%s722_s2] sm:$0xff]  ;;  %v236_v20 = vld [vmem:[%s724_s4 + $0x18] sm:$0xff]  ;;  %s451_s27 = sshll.u32 %s580_s26, 4  ;;  %s452_s27 = int_to_ptr.vmem [resolvable:$true] %s451_s27 }
   0xd   :  { %510 = vmatprep.mubr.msk.f32.mxu0 %vm87_vm1, %v35_v12  ;;  %v235_v21 = vld [vmem:[%s724_s4 + $0x10] sm:$0xff]  ;;  %v234_v22 = vld [vmem:[%s724_s4 + $0x8] sm:$0xff]  ;;  %v233_v23 = vld [vmem:[%s724_s4] sm:$0xff]  ;;  %s555_s28 = scalar_lea.vmem %s452_s27, 16  ;;  %s559_s29 = scalar_lea.vmem %s452_s27, 32 }
   0xe   :  { %v360_v24 = vld [vmem:[#allocation2] sm:$0x1]  ;;  %v230_v58 = vld [vmem:[%s723_s3 + $0x8] sm:$0xff]  ;;  %v231_v59 = vld [vmem:[%s723_s3 + $0x10] sm:$0xff]  ;;  %p556_p0 = scmp.ne.s32.totalorder %s452_s27, %s555_s28  ;;  %p560_p1 = scmp.lt.s32.totalorder %s452_s27, %s452_s27 }
   0xf   :  { %64 = vperm.xlu0 %553, %v42_v13   ;;  %v229_v25 = vld [vmem:[%s723_s3] sm:$0xff]  ;;  %v232_v60 = vld [vmem:[%s723_s3 + $0x18] sm:$0xff]  ;;  %p561_p2 = scmp.lt.s32.totalorder %s559_s29, %s555_s28 }
  0x10   :  { %511 = vmatmul.mubr.msk.f32.gmra.mxu0 %vm87_vm1, %v36_v14  ;;  %59 = vperm.xlu1 %554, %v41_v15   ;;  %v359_v14 = vld [vmem:[%s725_s5] sm:$0x1]  ;;  %v366_v15 = vlaneseq }
  0x11   :  { %513 = vmatprep.mubr.msk.f32.mxu0 %vm87_vm1, %v37_v16  ;;  %532 = vmatprep.mubr.msk.f32.mxu1 %vm257_vm2, %v229_v25  ;;  %p562_p3 = por %p561_p2, %p560_p1 }
  0x12   :  { %v367_v16 = vshrl.u32 %v366_v15, 7 }
  0x13   :  { %54 = vperm.xlu0 %553, %v40_v17   ;;  %p563_p4 = pnand %p562_p3, %p556_p0 }
  0x14   :  { %514 = vmatmul.mubr.msk.f32.gmra.mxu0 %vm87_vm1, %v38_v18  ;;  %49 = vperm.xlu1 %554, %v39_v19   ;;  %v368_v17 = vsub.s32 0, %v367_v16 }
  0x15   :  { %546 = vmatprep.mubr.msk.f32.mxu0 %vm579_vm3, %v578_v61 }
  0x17   :  { %254 = vperm.xlu0 %553, %v236_v20  }
  0x18   :  { %249 = vperm.xlu1 %554, %v235_v21  }
  0x1b   :  { %244 = vperm.xlu0 %553, %v234_v22  }
  0x1c   :  { %239 = vperm.xlu1 %554, %v233_v23  }
  0x1f   :  { %363 = vperm.xlu0 %553, %v360_v24  }
  0x82   :  { %v85_v28 = vpop.permute.xlu0 %84 }
  0x83   :  { %v75_v29 = vpop.permute.xlu1 %74 }
  0x86   :  { %v80_v33 = vpop.permute.xlu0 %79 }
  0x87   :  { %v70_v34 = vpop.permute.xlu1 %69 }
  0x8a   :  { %v65_v42 = vpop.permute.xlu0 %64 }
  0x8b   :  { %v60_v43 = vpop.permute.xlu1 %59 }
  0x8e   :  { %v55_v50 = vpop.permute.xlu0 %54 }
  0x8f   :  { %v50_v51 = vpop.permute.xlu1 %49 }
  0x92   :  { %v255_v62 = vpop.permute.xlu0 %254 }
  0x93   :  { %v250_v0 = vpop.permute.xlu1 %249 }
  0x96   :  { %v245_v4 = vpop.permute.xlu0 %244 }
  0x97   :  { %v240_v9 = vpop.permute.xlu1 %239 }
  0x9a   :  { %v364_v18 = vpop.permute.xlu0 %363 }
  0x9b   :  { %v369_v19 = vrot.slane %v364_v18, %v368_v17 }
  0xc8   :  { %v506_v26 = vpop.f32.mrf.mxu0 }
  0xc9   :  { %v188_v52 = vadd.f32 %v506_v26, %v55_v50 }
  0xca   :  { %v182_v27 = vpop.f32.mrf.mxu0 }
  0xcb   :  { %v183_v54 = vadd.f32 %v182_v27, %v50_v51  ;;  %v222_v56 = vmax.f32 %v188_v52, 0.0 }
  0xcc   :  { %v509_v30 = vpop.f32.mrf.mxu0 }
  0xcd   :  { %v198_v46 = vadd.f32 %v509_v30, %v65_v42  ;;  %v221_v57 = vmax.f32 %v183_v54, 0.0 }
  0xce   :  { %v192_v31 = vpop.f32.mrf.mxu0 }
  0xcf   :  { %v193_v48 = vadd.f32 %v192_v31, %v60_v43  ;;  %v224_v53 = vmax.f32 %v198_v46, 0.0 }
  0xd0   :  { %v512_v32 = vpop.f32.mrf.mxu0 }
  0xd1   :  { %v208_v39 = vadd.f32 %v512_v32, %v75_v29  ;;  %v223_v55 = vmax.f32 %v193_v48, 0.0 }
  0xd2   :  { %v202_v35 = vpop.f32.mrf.mxu0 }
  0xd3   :  { %v203_v44 = vadd.f32 %v202_v35, %v70_v34  ;;  %v226_v47 = vmax.f32 %v208_v39, 0.0 }
  0xd4   :  { %v515_v36 = vpop.f32.mrf.mxu0 }
  0xd5   :  { %v218_v37 = vadd.f32 %v515_v36, %v85_v28  ;;  %v225_v49 = vmax.f32 %v203_v44, 0.0 }
  0xd6   :  { %v212_v38 = vpop.f32.mrf.mxu0 }
  0xd7   :  { %v228_v40 = vmax.f32 %v218_v37, 0.0  ;;  %v213_v41 = vadd.f32 %v212_v38, %v80_v33 }
  0xd9   :  { %v227_v45 = vmax.f32 %v213_v41, 0.0  ;;  %516 = vmatprep.subr.mxu1 %v228_v40 }
  0xda   :  { %517 = vmatpush3.msra.mxu1 %v228_v40 }
  0xdb   :  { %518 = vmatprep.subr.mxu1 %v227_v45 }
  0xdc   :  { %519 = vmatpush3.msra.mxu1 %v227_v45 }
  0xdd   :  { %520 = vmatprep.subr.mxu1 %v226_v47 }
  0xde   :  { %521 = vmatpush3.msra.mxu1 %v226_v47 }
  0xdf   :  { %522 = vmatprep.subr.mxu1 %v225_v49 }
  0xe0   :  { %523 = vmatpush3.msra.mxu1 %v225_v49 }
  0xe1   :  { %524 = vmatprep.subr.mxu1 %v224_v53 }
  0xe2   :  { %525 = vmatpush3.msra.mxu1 %v224_v53 }
  0xe3   :  { %526 = vmatprep.subr.mxu1 %v223_v55 }
  0xe4   :  { %527 = vmatpush3.msra.mxu1 %v223_v55 }
  0xe5   :  { %528 = vmatprep.subr.mxu1 %v222_v56 }
  0xe6   :  { %529 = vmatpush3.msra.mxu1 %v222_v56 }
  0xe7   :  { %530 = vmatprep.subr.mxu1 %v221_v57 }
  0xe8   :  { %531 = vmatpush3.msra.mxu1 %v221_v57 }
  0xe9   :  { %533 = vmatmul.mubr.msk.f32.vlgmr.msra.gmra.mxu1 %vm257_vm2, %v230_v58 }
  0xea   :  { %535 = vmatprep.mubr.msk.f32.mxu1 %vm257_vm2, %v231_v59 }
  0xed   :  { %536 = vmatmul.mubr.msk.f32.gmra.mxu1 %vm257_vm2, %v232_v60 }
 0x1a9   :  { %v534_v63 = vpop.f32.mrf.mxu1 }
 0x1aa   :  { %v342_v6 = vadd.f32 %v534_v63, %v245_v4 }
 0x1ab   :  { %v336_v1 = vpop.f32.mrf.mxu1 }
 0x1ac   :  { %v337_v10 = vadd.f32 %v336_v1, %v240_v9  ;;  %v356_v12 = vmax.f32 %v342_v6, 0.0 }
 0x1ad   :  { %v537_v2 = vpop.f32.mrf.mxu1 }
 0x1ae   :  { %v352_v3 = vadd.f32 %v537_v2, %v255_v62  ;;  %v355_v13 = vmax.f32 %v337_v10, 0.0 }
 0x1af   :  { %v346_v5 = vpop.f32.mrf.mxu1 }
 0x1b0   :  { %v358_v7 = vmax.f32 %v352_v3, 0.0  ;;  %v347_v8 = vadd.f32 %v346_v5, %v250_v0 }
 0x1b2   :  { %v357_v11 = vmax.f32 %v347_v8, 0.0  ;;  %539 = vmatpush3.msra.mxu0 %v358_v7 }
 0x1b3   :  { %540 = vmatprep.subr.mxu0 %v578_v61 }
 0x1b4   :  { %541 = vmatpush3.msra.mxu0 %v357_v11 }
 0x1b5   :  { %542 = vmatprep.subr.mxu0 %v578_v61 }
 0x1b6   :  { %543 = vmatpush3.msra.mxu0 %v356_v12 }
 0x1b7   :  { %544 = vmatprep.subr.mxu0 %v578_v61 }
 0x1b8   :  { %545 = vmatpush3.msra.mxu0 %v355_v13 }
 0x1b9   :  { %547 = vmatmul.mubr.msk.f32.vlgmr.msra.gmra.mxu0 %vm370_vm4, %v359_v14 }
 0x279   :  { %v440_v20 = vpop.f32.mrf.mxu0 }
 0x27a   :  { %v441_v21 = vadd.f32 %v440_v20, %v369_v19 }
 0x27b   :  { %v548_v22 = vpop.f32.mrf.mxu0 }
 0x27c   :  { %444 = vst [vmem:[#allocation3] sm:$0x1] %v441_v21 }
 0x27d   :  { %566 = shalt.err (!%p563_p4)
}
 0x27e   :  { %454 = dma.vmem_to_hbm [thread:$0]  %s452_s27, 16, %s727_s7, [#allocation4]  }
 0x27f   :  { %575 = dma.done.wait [#allocation4], 16  }
 0x280   :  { %576 = vsyncadd [#allocation4], 4294967280 }
 0x281   :  { %458 = vsyncpa [#allocation4], 1 }

</bundles_post_ra>
